<compile_context>
chip_gen: v7x
topology: tpu7x:2x2x1
jax: 0.10.0
libtpu: 0.0.40
codegen_flags: <defaults>
</compile_context>

<pallas_src>
import jax
import jax.numpy as jnp
from jax.experimental import pallas as pl
from jax.experimental.pallas import tpu as pltpu

_LANE = 128     # vreg lane width
_SUBLANE = 8    # f32 sublane height


def _round_up(x, m):
    return ((x + m - 1) // m) * m


def _ctce_mlp_kernel(x_ref, w1_ref, b1_ref, w2_ref, b2_ref, w3_ref, b3_ref, o_ref):
    """relu(x@W1+b1) -> relu(.@W2+b2) -> .@W3+b3 on one batch tile.

    bf16 operands feed the MXU, accumulation stays f32, biases are f32.
    """
    h1 = jnp.dot(x_ref[...], w1_ref[...], preferred_element_type=jnp.float32) + b1_ref[...]
    h1 = jnp.maximum(h1, 0.0).astype(w2_ref.dtype)
    h2 = jnp.dot(h1, w2_ref[...], preferred_element_type=jnp.float32) + b2_ref[...]
    h2 = jnp.maximum(h2, 0.0).astype(w3_ref.dtype)
    out = jnp.dot(h2, w3_ref[...], preferred_element_type=jnp.float32) + b3_ref[...]
    o_ref[...] = out.astype(o_ref.dtype)


def _vmem_capacity_bytes():
    try:
        return int(pltpu.get_tpu_info().vmem_capacity_bytes)
    except Exception:
        return 64 * 1024 * 1024  # conservative, v7x-sized fallback


def _vmem_bytes_needed(tile_b, d_in, d_out_p, weight_buffers):
    """Exact per-buffer VMEM byte count (2x pipelined activation tiles +
    weight_buffers copies of the resident weights/biases)."""
    bf16, f32 = 2, 4
    x_tile = tile_b * _round_up(d_in, _LANE) * bf16
    o_tile = tile_b * d_out_p * f32
    weights = (_round_up(d_in, _SUBLANE) * d_out_p + 2 * d_out_p * d_out_p) * bf16
    biases = 3 * _SUBLANE * d_out_p * f32
    return 2 * x_tile + 2 * o_tile + weight_buffers * (weights + biases)


def _batch_tiling(B):
    """Batch tile (multiple of 8 sublanes, <= 512 rows), split so the grid has
    >= 2 tiles whenever possible (keeps both v7x TensorCores busy)."""
    tile_b = min(512, _round_up(B, _SUBLANE))
    if B > _SUBLANE and pl.cdiv(B, tile_b) < 2:
        tile_b = _round_up(pl.cdiv(B, 2), _SUBLANE)
    return tile_b, pl.cdiv(B, tile_b)


def _mlp_pallas_call(x, w1, b1, w2, b2, w3, b3, *, tile_b, num_tiles, d_out_p,
                     vmem_limit, cost, single_buffer_weights):
    B, d_in = x.shape

    if single_buffer_weights:
        def const_spec(shape):
            # Constant index map -> fetched once; 1 buffer avoids duplicating the
            # resident weights in VMEM (important on v7x's 64 MiB).
            return pl.BlockSpec(shape, lambda i: (0, 0), pipeline_mode=pl.Buffered(1))
    else:
        def const_spec(shape):
            return pl.BlockSpec(shape, lambda i: (0, 0))

    return pl.pallas_call(
        _ctce_mlp_kernel,
        out_shape=jax.ShapeDtypeStruct((B, d_out_p), jnp.float32),
        grid=(num_tiles,),
        in_specs=[
            pl.BlockSpec((tile_b, d_in), lambda i: (i, 0)),   # x: tiled over batch
            const_spec((d_in, d_out_p)),                      # W1 (VMEM-resident)
            const_spec((1, d_out_p)),                         # b1
            const_spec((d_out_p, d_out_p)),                   # W2
            const_spec((1, d_out_p)),                         # b2
            const_spec((d_out_p, d_out_p)),                   # W3
            const_spec((1, d_out_p)),                         # b3
        ],
        out_specs=pl.BlockSpec((tile_b, d_out_p), lambda i: (i, 0)),
        compiler_params=pltpu.CompilerParams(
            dimension_semantics=("parallel",),
            vmem_limit_bytes=vmem_limit,
        ),
        cost_estimate=cost,
    )(x, w1, b1, w2, b2, w3, b3)


def ctce_agent_forward(inputs, hidden_state, prepared_params, *, n_nodes, n_actions):
    """JAX wrapper reproducing CTCEAgent.forward.

    inputs: (batch * n_nodes, input_shape) float32
    hidden_state: passed through unchanged
    prepared_params: output of prepare_params() (padded, bf16 weights)
    returns: (q, hidden_state) with q of shape (batch * n_nodes, n_actions)
    """
    input_shape = inputs.shape[1]
    d_in = n_nodes * input_shape
    d_out = n_nodes * n_actions
    d_out_p = _round_up(d_out, _LANE)

    # x = inputs.view(-1, n_nodes, input_shape).view(B, -1) -> a single reshape.
    x = inputs.reshape(-1, d_in).astype(jnp.bfloat16)
    B = x.shape[0]

    tile_b, num_tiles = _batch_tiling(B)

    cap = int(0.85 * _vmem_capacity_bytes())
    need = _vmem_bytes_needed(tile_b, d_in, d_out_p, weight_buffers=2)  # worst case
    vmem_limit = int(min(cap, max(32 << 20, need + (8 << 20))))
    # TODO(synk): if resident weights (W1 + 2*d_out_p^2 in bf16) ever exceed ~40 MiB
    # (huge n_nodes*n_actions), add a column/contraction grid axis over the weights
    # instead of keeping them fully VMEM-resident (required on v7x's 64 MiB VMEM).

    cost = pl.CostEstimate(
        flops=2 * B * (d_in * d_out_p + 2 * d_out_p * d_out_p),
        transcendentals=0,
        bytes_accessed=(
            2 * B * d_in + 4 * B * d_out_p
            + 2 * (d_in * d_out_p + 2 * d_out_p * d_out_p) + 4 * 3 * d_out_p
        ),
    )

    p = prepared_params
    args = (x, p["w1"], p["b1"], p["w2"], p["b2"], p["w3"], p["b3"])
    kwargs = dict(tile_b=tile_b, num_tiles=num_tiles, d_out_p=d_out_p,
                  vmem_limit=vmem_limit, cost=cost)

    if hasattr(pl, "Buffered"):
        try:
            out = _mlp_pallas_call(*args, single_buffer_weights=True, **kwargs)
        except Exception:
            # Portability fallback: default (double) buffering of the weights.
            out = _mlp_pallas_call(*args, single_buffer_weights=False, **kwargs)
    else:
        out = _mlp_pallas_call(*args, single_buffer_weights=False, **kwargs)

    # Slice off lane padding, then x.view(-1, n_actions).
    q = out[:, :d_out].reshape(-1, n_actions)
    return q, hidden_state


def init_params(key, n_nodes, input_shape, n_actions):
    """nn.Linear-style init (uniform +-1/sqrt(fan_in)); weights stored (in, out), f32."""
    d_in = n_nodes * input_shape
    d_out = n_nodes * n_actions
    keys = jax.random.split(key, 6)

    def lin(kw, kb, fan_in, fan_out):
        bound = 1.0 / jnp.sqrt(jnp.float32(fan_in))
        w = jax.random.uniform(kw, (fan_in, fan_out), jnp.float32, -bound, bound)
        b = jax.random.uniform(kb, (1, fan_out), jnp.float32, -bound, bound)
        return w, b

    w1, b1 = lin(keys[0], keys[1], d_in, d_out)
    w2, b2 = lin(keys[2], keys[3], d_out, d_out)
    w3, b3 = lin(keys[4], keys[5], d_out, d_out)
    return {"w1": w1, "b1": b1, "w2": w2, "b2": b2, "w3": w3, "b3": b3}


def prepare_params(params, *, n_nodes, input_shape, n_actions):
    """One-time output-dim padding (to 128-lane multiples) + bf16 cast of weights.

    Zero padding is exact for a ReLU MLP.  Done once here so the per-call forward
    never re-materializes padded weight copies in HBM.
    """
    d_in = n_nodes * input_shape
    d_out = n_nodes * n_actions
    d_out_p = _round_up(d_out, _LANE)

    def pad(a, rows, cols, dtype):
        out = jnp.zeros((rows, cols), dtype)
        return out.at[: a.shape[0], : a.shape[1]].set(a.astype(dtype))

    return {
        "w1": pad(params["w1"], d_in, d_out_p, jnp.bfloat16),
        "b1": pad(params["b1"], 1, d_out_p, jnp.float32),
        "w2": pad(params["w2"], d_out_p, d_out_p, jnp.bfloat16),
        "b2": pad(params["b2"], 1, d_out_p, jnp.float32),
        "w3": pad(params["w3"], d_out_p, d_out_p, jnp.bfloat16),
        "b3": pad(params["b3"], 1, d_out_p, jnp.float32),
    }


def _reference_forward(inputs, params, n_nodes, n_actions):
    """Pure-JAX reference with matching bf16-operand / f32-accumulate numerics."""
    input_shape = inputs.shape[1]
    x = inputs.reshape(-1, n_nodes * input_shape).astype(jnp.bfloat16)
    w1 = params["w1"].astype(jnp.bfloat16)
    w2 = params["w2"].astype(jnp.bfloat16)
    w3 = params["w3"].astype(jnp.bfloat16)
    h1 = jnp.maximum(jnp.dot(x, w1, preferred_element_type=jnp.float32) + params["b1"], 0.0)
    h1 = h1.astype(jnp.bfloat16)
    h2 = jnp.maximum(jnp.dot(h1, w2, preferred_element_type=jnp.float32) + params["b2"], 0.0)
    h2 = h2.astype(jnp.bfloat16)
    out = jnp.dot(h2, w3, preferred_element_type=jnp.float32) + params["b3"]
    return out.reshape(-1, n_actions)


if __name__ == "__main__":
    # Small, module-consistent shapes: graph with n_nodes nodes, per-node obs of
    # size input_shape, n_actions actions, batch_size_run graphs per step.
    n_nodes = 4
    input_shape = 6
    n_actions = 5
    hidden_dim = 32  # only used for the (pass-through) hidden state

    key = jax.random.PRNGKey(0)
    k_in1, k_in2, k_param = jax.random.split(key, 3)

    params = init_params(k_param, n_nodes, input_shape, n_actions)
    prepared = prepare_params(params, n_nodes=n_nodes, input_shape=input_shape,
                              n_actions=n_actions)
    hidden_state = jnp.zeros((1, hidden_dim), jnp.float32)  # init_hidden()

    # Case 1: tiny, module-default shape (batch_size_run = 2 graphs).
    B1 = 2
    inputs1 = jax.random.normal(k_in1, (B1 * n_nodes, input_shape), jnp.float32)
    q1, h_out = ctce_agent_forward(inputs1, hidden_state, prepared,
                                   n_nodes=n_nodes, n_actions=n_actions)
    q1 = jax.block_until_ready(q1)
    h_out = jax.block_until_ready(h_out)
    ref1 = _reference_forward(inputs1, params, n_nodes, n_actions)
    assert q1.shape == (B1 * n_nodes, n_actions), q1.shape
    assert h_out.shape == hidden_state.shape
    assert jnp.allclose(q1, ref1, atol=1e-2, rtol=1e-2), "mismatch vs reference (B=2)"

    # Case 2: exercises the multi-tile grid and the ragged last batch block.
    B2 = 40
    inputs2 = jax.random.normal(k_in2, (B2 * n_nodes, input_shape), jnp.float32)
    q2, _ = ctce_agent_forward(inputs2, hidden_state, prepared,
                               n_nodes=n_nodes, n_actions=n_actions)
    q2 = jax.block_until_ready(q2)
    ref2 = _reference_forward(inputs2, params, n_nodes, n_actions)
    assert q2.shape == (B2 * n_nodes, n_actions), q2.shape
    assert jnp.allclose(q2, ref2, atol=1e-2, rtol=1e-2), "mismatch vs reference (B=40)"

    print("KERNEL_OK")
</pallas_src>

<mosaic_0001>
module attributes {stable_mosaic.version = 11 : i64} {
  func.func @_ctce_mlp_kernel(%arg0: i32, %arg1: memref<8x24xbf16, #tpu.memory_space<vmem>>, %arg2: memref<24x128xbf16, #tpu.memory_space<vmem>>, %arg3: memref<1x128xf32, #tpu.memory_space<vmem>>, %arg4: memref<128x128xbf16, #tpu.memory_space<vmem>>, %arg5: memref<1x128xf32, #tpu.memory_space<vmem>>, %arg6: memref<128x128xbf16, #tpu.memory_space<vmem>>, %arg7: memref<1x128xf32, #tpu.memory_space<vmem>>, %arg8: memref<8x128xf32, #tpu.memory_space<vmem>>) attributes {dimension_semantics = [#tpu.dimension_semantics<parallel>], iteration_bounds = array<i64: 1>, scalar_prefetch = 0 : i64, scratch_operands = 0 : i64, tpu.core_type = #tpu.core_type<tc>, window_params = [{transform_indices = @transform_0, window_bounds = array<i64: 8, 24>}, {pipeline_mode = #tpu.pipeline_mode<synchronous>, transform_indices = @transform_1, window_bounds = array<i64: 24, 128>}, {pipeline_mode = #tpu.pipeline_mode<synchronous>, transform_indices = @transform_2, window_bounds = array<i64: 1, 128>}, {pipeline_mode = #tpu.pipeline_mode<synchronous>, transform_indices = @transform_3, window_bounds = array<i64: 128, 128>}, {pipeline_mode = #tpu.pipeline_mode<synchronous>, transform_indices = @transform_4, window_bounds = array<i64: 1, 128>}, {pipeline_mode = #tpu.pipeline_mode<synchronous>, transform_indices = @transform_5, window_bounds = array<i64: 128, 128>}, {pipeline_mode = #tpu.pipeline_mode<synchronous>, transform_indices = @transform_6, window_bounds = array<i64: 1, 128>}, {transform_indices = @transform_7, window_bounds = array<i64: 8, 128>}]} {
    %c0 = arith.constant 0 : index
    %c0_0 = arith.constant 0 : index
    %0 = vector.load %arg1[%c0, %c0_0] : memref<8x24xbf16, #tpu.memory_space<vmem>>, vector<8x24xbf16>
    %c0_1 = arith.constant 0 : index
    %c0_2 = arith.constant 0 : index
    %1 = vector.load %arg2[%c0_1, %c0_2] : memref<24x128xbf16, #tpu.memory_space<vmem>>, vector<24x128xbf16>
    %cst = arith.constant dense<0.000000e+00> : vector<8x128xf32>
    %2 = tpu.matmul %0, %1, %cst {dimension_numbers = #tpu.dot_dimension_numbers<[1], [0], [0], [1], [0, 0, 1, 1], [], []>} : vector<8x24xbf16>, vector<24x128xbf16>, vector<8x128xf32> -> vector<8x128xf32>
    %c0_3 = arith.constant 0 : index
    %c0_4 = arith.constant 0 : index
    %3 = vector.load %arg3[%c0_3, %c0_4] : memref<1x128xf32, #tpu.memory_space<vmem>>, vector<1x128xf32>
    %4 = vector.broadcast %3 : vector<1x128xf32> to vector<8x128xf32>
    %5 = arith.addf %2, %4 : vector<8x128xf32>
    %cst_5 = arith.constant 0.000000e+00 : f32
    %6 = vector.broadcast %cst_5 : f32 to vector<8x128xf32>
    %7 = arith.maximumf %5, %6 : vector<8x128xf32>
    %8 = arith.truncf %7 : vector<8x128xf32> to vector<8x128xbf16>
    %c0_6 = arith.constant 0 : index
    %c0_7 = arith.constant 0 : index
    %9 = vector.load %arg4[%c0_6, %c0_7] : memref<128x128xbf16, #tpu.memory_space<vmem>>, vector<128x128xbf16>
    %cst_8 = arith.constant dense<0.000000e+00> : vector<8x128xf32>
    %10 = tpu.matmul %8, %9, %cst_8 {dimension_numbers = #tpu.dot_dimension_numbers<[1], [0], [0], [1], [0, 0, 1, 1], [], []>} : vector<8x128xbf16>, vector<128x128xbf16>, vector<8x128xf32> -> vector<8x128xf32>
    %c0_9 = arith.constant 0 : index
    %c0_10 = arith.constant 0 : index
    %11 = vector.load %arg5[%c0_9, %c0_10] : memref<1x128xf32, #tpu.memory_space<vmem>>, vector<1x128xf32>
    %12 = vector.broadcast %11 : vector<1x128xf32> to vector<8x128xf32>
    %13 = arith.addf %10, %12 : vector<8x128xf32>
    %cst_11 = arith.constant 0.000000e+00 : f32
    %14 = vector.broadcast %cst_11 : f32 to vector<8x128xf32>
    %15 = arith.maximumf %13, %14 : vector<8x128xf32>
    %16 = arith.truncf %15 : vector<8x128xf32> to vector<8x128xbf16>
    %c0_12 = arith.constant 0 : index
    %c0_13 = arith.constant 0 : index
    %17 = vector.load %arg6[%c0_12, %c0_13] : memref<128x128xbf16, #tpu.memory_space<vmem>>, vector<128x128xbf16>
    %cst_14 = arith.constant dense<0.000000e+00> : vector<8x128xf32>
    %18 = tpu.matmul %16, %17, %cst_14 {dimension_numbers = #tpu.dot_dimension_numbers<[1], [0], [0], [1], [0, 0, 1, 1], [], []>} : vector<8x128xbf16>, vector<128x128xbf16>, vector<8x128xf32> -> vector<8x128xf32>
    %c0_15 = arith.constant 0 : index
    %c0_16 = arith.constant 0 : index
    %19 = vector.load %arg7[%c0_15, %c0_16] : memref<1x128xf32, #tpu.memory_space<vmem>>, vector<1x128xf32>
    %20 = vector.broadcast %19 : vector<1x128xf32> to vector<8x128xf32>
    %21 = arith.addf %18, %20 : vector<8x128xf32>
    %c0_17 = arith.constant 0 : index
    %c0_18 = arith.constant 0 : index
    %22 = vector.load %arg8[%c0_17, %c0_18] : memref<8x128xf32, #tpu.memory_space<vmem>>, vector<8x128xf32>
    tpu.vector_store %arg8[%c0_17, %c0_18], %21 {strides = array<i32>} : memref<8x128xf32, #tpu.memory_space<vmem>>, vector<8x128xf32>,
    return
  }
  func.func @transform_0(%arg0: i32) -> (i32, i32) {
    %c0_i32 = arith.constant 0 : i32
    %c0_i32_0 = arith.constant 0 : i32
    return %arg0, %c0_i32 : i32, i32
  }
  func.func @transform_1(%arg0: i32) -> (i32, i32) {
    %c0_i32 = arith.constant 0 : i32
    %c0_i32_0 = arith.constant 0 : i32
    %c0_i32_1 = arith.constant 0 : i32
    return %c0_i32, %c0_i32_0 : i32, i32
  }
  func.func @transform_2(%arg0: i32) -> (i32, i32) {
    %c0_i32 = arith.constant 0 : i32
    %c0_i32_0 = arith.constant 0 : i32
    %c0_i32_1 = arith.constant 0 : i32
    return %c0_i32, %c0_i32_0 : i32, i32
  }
  func.func @transform_3(%arg0: i32) -> (i32, i32) {
    %c0_i32 = arith.constant 0 : i32
    %c0_i32_0 = arith.constant 0 : i32
    %c0_i32_1 = arith.constant 0 : i32
    return %c0_i32, %c0_i32_0 : i32, i32
  }
  func.func @transform_4(%arg0: i32) -> (i32, i32) {
    %c0_i32 = arith.constant 0 : i32
    %c0_i32_0 = arith.constant 0 : i32
    %c0_i32_1 = arith.constant 0 : i32
    return %c0_i32, %c0_i32_0 : i32, i32
  }
  func.func @transform_5(%arg0: i32) -> (i32, i32) {
    %c0_i32 = arith.constant 0 : i32
    %c0_i32_0 = arith.constant 0 : i32
    %c0_i32_1 = arith.constant 0 : i32
    return %c0_i32, %c0_i32_0 : i32, i32
  }
  func.func @transform_6(%arg0: i32) -> (i32, i32) {
    %c0_i32 = arith.constant 0 : i32
    %c0_i32_0 = arith.constant 0 : i32
    %c0_i32_1 = arith.constant 0 : i32
    return %c0_i32, %c0_i32_0 : i32, i32
  }
  func.func @transform_7(%arg0: i32) -> (i32, i32) {
    %c0_i32 = arith.constant 0 : i32
    %c0_i32_0 = arith.constant 0 : i32
    return %arg0, %c0_i32 : i32, i32
  }
}

module attributes {stable_mosaic.version = 11 : i64} {
  func.func @_ctce_mlp_kernel(%arg0: i32, %arg1: memref<8x24xbf16, #tpu.memory_space<vmem>>, %arg2: memref<24x128xbf16, #tpu.memory_space<vmem>>, %arg3: memref<1x128xf32, #tpu.memory_space<vmem>>, %arg4: memref<128x128xbf16, #tpu.memory_space<vmem>>, %arg5: memref<1x128xf32, #tpu.memory_space<vmem>>, %arg6: memref<128x128xbf16, #tpu.memory_space<vmem>>, %arg7: memref<1x128xf32, #tpu.memory_space<vmem>>, %arg8: memref<8x128xf32, #tpu.memory_space<vmem>>) attributes {dimension_semantics = [#tpu.dimension_semantics<parallel>], iteration_bounds = array<i64: 1>, scalar_prefetch = 0 : i64, scratch_operands = 0 : i64, tpu.core_type = #tpu.core_type<tc>, window_params = [{transform_indices = @transform_0, window_bounds = array<i64: 8, 24>}, {pipeline_mode = #tpu.pipeline_mode<synchronous>, transform_indices = @transform_1, window_bounds = array<i64: 24, 128>}, {pipeline_mode = #tpu.pipeline_mode<synchronous>, transform_indices = @transform_2, window_bounds = array<i64: 1, 128>}, {pipeline_mode = #tpu.pipeline_mode<synchronous>, transform_indices = @transform_3, window_bounds = array<i64: 128, 128>}, {pipeline_mode = #tpu.pipeline_mode<synchronous>, transform_indices = @transform_4, window_bounds = array<i64: 1, 128>}, {pipeline_mode = #tpu.pipeline_mode<synchronous>, transform_indices = @transform_5, window_bounds = array<i64: 128, 128>}, {pipeline_mode = #tpu.pipeline_mode<synchronous>, transform_indices = @transform_6, window_bounds = array<i64: 1, 128>}, {transform_indices = @transform_7, window_bounds = array<i64: 8, 128>}]} {
    %c0 = arith.constant 0 : index
    %c0_0 = arith.constant 0 : index
    %0 = vector.load %arg1[%c0, %c0_0] : memref<8x24xbf16, #tpu.memory_space<vmem>>, vector<8x24xbf16>
    %c0_1 = arith.constant 0 : index
    %c0_2 = arith.constant 0 : index
    %1 = vector.load %arg2[%c0_1, %c0_2] : memref<24x128xbf16, #tpu.memory_space<vmem>>, vector<24x128xbf16>
    %cst = arith.constant dense<0.000000e+00> : vector<8x128xf32>
    %2 = tpu.matmul %0, %1, %cst {dimension_numbers = #tpu.dot_dimension_numbers<[1], [0], [0], [1], [0, 0, 1, 1], [], []>} : vector<8x24xbf16>, vector<24x128xbf16>, vector<8x128xf32> -> vector<8x128xf32>
    %c0_3 = arith.constant 0 : index
    %c0_4 = arith.constant 0 : index
    %3 = vector.load %arg3[%c0_3, %c0_4] : memref<1x128xf32, #tpu.memory_space<vmem>>, vector<1x128xf32>
    %4 = vector.broadcast %3 : vector<1x128xf32> to vector<8x128xf32>
    %5 = arith.addf %2, %4 : vector<8x128xf32>
    %cst_5 = arith.constant 0.000000e+00 : f32
    %6 = vector.broadcast %cst_5 : f32 to vector<8x128xf32>
    %7 = arith.maximumf %5, %6 : vector<8x128xf32>
    %8 = arith.truncf %7 : vector<8x128xf32> to vector<8x128xbf16>
    %c0_6 = arith.constant 0 : index
    %c0_7 = arith.constant 0 : index
    %9 = vector.load %arg4[%c0_6, %c0_7] : memref<128x128xbf16, #tpu.memory_space<vmem>>, vector<128x128xbf16>
    %cst_8 = arith.constant dense<0.000000e+00> : vector<8x128xf32>
    %10 = tpu.matmul %8, %9, %cst_8 {dimension_numbers = #tpu.dot_dimension_numbers<[1], [0], [0], [1], [0, 0, 1, 1], [], []>} : vector<8x128xbf16>, vector<128x128xbf16>, vector<8x128xf32> -> vector<8x128xf32>
    %c0_9 = arith.constant 0 : index
    %c0_10 = arith.constant 0 : index
    %11 = vector.load %arg5[%c0_9, %c0_10] : memref<1x128xf32, #tpu.memory_space<vmem>>, vector<1x128xf32>
    %12 = vector.broadcast %11 : vector<1x128xf32> to vector<8x128xf32>
    %13 = arith.addf %10, %12 : vector<8x128xf32>
    %cst_11 = arith.constant 0.000000e+00 : f32
    %14 = vector.broadcast %cst_11 : f32 to vector<8x128xf32>
    %15 = arith.maximumf %13, %14 : vector<8x128xf32>
    %16 = arith.truncf %15 : vector<8x128xf32> to vector<8x128xbf16>
    %c0_12 = arith.constant 0 : index
    %c0_13 = arith.constant 0 : index
    %17 = vector.load %arg6[%c0_12, %c0_13] : memref<128x128xbf16, #tpu.memory_space<vmem>>, vector<128x128xbf16>
    %cst_14 = arith.constant dense<0.000000e+00> : vector<8x128xf32>
    %18 = tpu.matmul %16, %17, %cst_14 {dimension_numbers = #tpu.dot_dimension_numbers<[1], [0], [0], [1], [0, 0, 1, 1], [], []>} : vector<8x128xbf16>, vector<128x128xbf16>, vector<8x128xf32> -> vector<8x128xf32>
    %c0_15 = arith.constant 0 : index
    %c0_16 = arith.constant 0 : index
    %19 = vector.load %arg7[%c0_15, %c0_16] : memref<1x128xf32, #tpu.memory_space<vmem>>, vector<1x128xf32>
    %20 = vector.broadcast %19 : vector<1x128xf32> to vector<8x128xf32>
    %21 = arith.addf %18, %20 : vector<8x128xf32>
    %c0_17 = arith.constant 0 : index
    %c0_18 = arith.constant 0 : index
    %22 = vector.load %arg8[%c0_17, %c0_18] : memref<8x128xf32, #tpu.memory_space<vmem>>, vector<8x128xf32>
    tpu.vector_store %arg8[%c0_17, %c0_18], %21 {strides = array<i32>} : memref<8x128xf32, #tpu.memory_space<vmem>>, vector<8x128xf32>,
    return
  }
  func.func @transform_0(%arg0: i32) -> (i32, i32) {
    %c0_i32 = arith.constant 0 : i32
    %c0_i32_0 = arith.constant 0 : i32
    return %arg0, %c0_i32 : i32, i32
  }
  func.func @transform_1(%arg0: i32) -> (i32, i32) {
    %c0_i32 = arith.constant 0 : i32
    %c0_i32_0 = arith.constant 0 : i32
    %c0_i32_1 = arith.constant 0 : i32
    return %c0_i32, %c0_i32_0 : i32, i32
  }
  func.func @transform_2(%arg0: i32) -> (i32, i32) {
    %c0_i32 = arith.constant 0 : i32
    %c0_i32_0 = arith.constant 0 : i32
    %c0_i32_1 = arith.constant 0 : i32
    return %c0_i32, %c0_i32_0 : i32, i32
  }
  func.func @transform_3(%arg0: i32) -> (i32, i32) {
    %c0_i32 = arith.constant 0 : i32
    %c0_i32_0 = arith.constant 0 : i32
    %c0_i32_1 = arith.constant 0 : i32
    return %c0_i32, %c0_i32_0 : i32, i32
  }
  func.func @transform_4(%arg0: i32) -> (i32, i32) {
    %c0_i32 = arith.constant 0 : i32
    %c0_i32_0 = arith.constant 0 : i32
    %c0_i32_1 = arith.constant 0 : i32
    return %c0_i32, %c0_i32_0 : i32, i32
  }
  func.func @transform_5(%arg0: i32) -> (i32, i32) {
    %c0_i32 = arith.constant 0 : i32
    %c0_i32_0 = arith.constant 0 : i32
    %c0_i32_1 = arith.constant 0 : i32
    return %c0_i32, %c0_i32_0 : i32, i32
  }
  func.func @transform_6(%arg0: i32) -> (i32, i32) {
    %c0_i32 = arith.constant 0 : i32
    %c0_i32_0 = arith.constant 0 : i32
    %c0_i32_1 = arith.constant 0 : i32
    return %c0_i32, %c0_i32_0 : i32, i32
  }
  func.func @transform_7(%arg0: i32) -> (i32, i32) {
    %c0_i32 = arith.constant 0 : i32
    %c0_i32_0 = arith.constant 0 : i32
    return %arg0, %c0_i32 : i32, i32
  }
}

</mosaic_0001>

<bundles_post_ra>
// kernel: tpu_custom_call.1
= control target key start
LH: loop header
LB: loop body
LE: loop exit
PB: predicated region body
PF: predicated region fallthrough
CT: control target
= control target key end

     0   :  { %12 = vsyncpa [#allocation3], 0  ;;  %s832_s0 = inlined_call_operand.hbm [shape: bf16[2,24], index: 0, kind: input, shape index: {}]   ;;  %s833_s1 = inlined_call_operand.hbm [shape: bf16[24,128], index: 1, kind: input, shape index: {}]   ;;  %s834_s2 = inlined_call_operand.vmem [shape: f32[1,128], index: 2, kind: input, shape index: {}]   ;;  %s835_s3 = inlined_call_operand.hbm [shape: bf16[128,128], index: 3, kind: input, shape index: {}]   ;;  %s836_s4 = inlined_call_operand.vmem [shape: f32[1,128], index: 4, kind: input, shape index: {}]   ;;  %s837_s5 = inlined_call_operand.hbm [shape: bf16[128,128], index: 5, kind: input, shape index: {}]   ;;  %s838_s6 = inlined_call_operand.vmem [shape: f32[1,128], index: 6, kind: input, shape index: {}]   ;;  %s839_s7 = inlined_call_operand.hbm [shape: f32[2,128], index: 7, kind: output, shape index: {}]  }
   0x1   :  { %13 = vsyncpa [#allocation6], 0 }
   0x2   :  { %14 = vsyncpa [#allocation9], 0 }
   0x3   :  { %15 = vsyncpa [#allocation4], 0 }
   0x4   :  { %20 = vsyncadd [#allocation3], 48  ;;  %s669_s24 = smov [#allocation5]   ;;  %s551_s28 = scalar_lea.hbm %s833_s1, 192 }
   0x5   :  { %s33_s25 = sshll.u32 %s669_s24, 4  ;;  %p552_p0 = scmp.ne.s32.totalorder %s833_s1, %s551_s28  ;;  %s34_s25 = int_to_ptr.vmem [resolvable:$true] %s33_s25 }
   0x6   :  { %p555_p1 = scmp.lt.u32.totalorder %s551_s28, %s833_s1 }
   0x8   :  { %p557_p2 = pnand %p555_p1, %p552_p0 }
   0xa   :  { %560 = shalt.err (!%p557_p2)
}
   0xb   :  { %s561_s10 = scalar_lea.vmem %s34_s25, 192  ;;  %p566_p4 = scmp.lt.s32.totalorder %s34_s25, %s34_s25 }
   0xc   :  { %p562_p3 = scmp.ne.s32.totalorder %s34_s25, %s561_s10  ;;  %p567_p5 = scmp.lt.s32.totalorder %s561_s10, %s561_s10 }
   0xe   :  { %p568_p6 = por %p567_p5, %p566_p4 }
  0x10   :  { %p569_p7 = pnand %p568_p6, %p562_p3 }
  0x12   :  { %572 = shalt.err (!%p569_p7)
}
  0x13   :  { %s670_s11 = smov 64   ;;  %s671_s12 = smov 4  }
  0x14   :  { %39 = dma.hbm_to_vmem [thread:$0]  %s833_s1, 192, %s34_s25, [#allocation6], %s670_s11, %s670_s11, %s671_s12  }
  0x15   :  { %s672_s15 = smov [#allocation2]   ;;  %s573_s19 = scalar_lea.hbm %s832_s0, 16 }
  0x16   :  { %s21_s16 = sshll.u32 %s672_s15, 4  ;;  %p574_p8 = scmp.ne.s32.totalorder %s832_s0, %s573_s19  ;;  %s22_s16 = int_to_ptr.vmem [resolvable:$true] %s21_s16 }
  0x17   :  { %p577_p9 = scmp.lt.u32.totalorder %s573_s19, %s832_s0 }
  0x19   :  { %p579_p10 = pnand %p577_p9, %p574_p8 }
  0x1b   :  { %582 = shalt.err (!%p579_p10)
}
  0x1c   :  { %s583_s24 = scalar_lea.vmem %s22_s16, 16  ;;  %s587_s1 = scalar_lea.vmem %s22_s16, 64 }
  0x1d   :  { %p584_p11 = scmp.ne.s32.totalorder %s22_s16, %s583_s24  ;;  %p588_p12 = scmp.lt.s32.totalorder %s22_s16, %s22_s16 }
  0x1e   :  { %p589_p13 = scmp.lt.s32.totalorder %s587_s1, %s583_s24 }
  0x20   :  { %p590_p0 = por %p589_p13, %p588_p12 }
  0x22   :  { %p591_p1 = pnand %p590_p0, %p584_p11 }
  0x24   :  { %594 = shalt.err (!%p591_p1)
}
  0x25   :  { %s673_s25 = smov 16   ;;  %s674_s26 = smov 1  }
  0x26   :  { %27 = dma.hbm_to_vmem [thread:$0]  %s832_s0, 16, %s22_s16, [#allocation3], %s673_s25, %s673_s25, %s674_s26  }
  0x27   :  { %s675_s29 = smov [#allocation7]   ;;  %s676_s8 = smov [#allocation8]  }
  0x28   :  { %s47_s30 = sshll.u32 %s675_s29, 4  ;;  %s61_s9 = sshll.u32 %s676_s8, 4  ;;  %s48_s30 = int_to_ptr.vmem [resolvable:$true] %s47_s30  ;;  %s750_s9 = int_to_ptr.vmem [resolvable:$true] %s61_s9 }
  0x29   :  { %s595_s14 = scalar_lea.hbm %s835_s3, 1024 }
  0x2a   :  { %p596_p2 = scmp.ne.s32.totalorder %s835_s3, %s595_s14  ;;  %p599_p3 = scmp.lt.u32.totalorder %s595_s14, %s835_s3 }
  0x2c   :  { %p601_p4 = pnand %p599_p3, %p596_p2 }
  0x2e   :  { %604 = shalt.err (!%p601_p4)
}
  0x2f   :  { %s605_s0 = scalar_lea.vmem %s48_s30, 1024  ;;  %p610_p6 = scmp.lt.s32.totalorder %s48_s30, %s48_s30 }
  0x30   :  { %p606_p5 = scmp.ne.s32.totalorder %s48_s30, %s605_s0  ;;  %p611_p7 = scmp.lt.s32.totalorder %s605_s0, %s605_s0 }
  0x32   :  { %p612_p8 = por %p611_p7, %p610_p6 }
  0x34   :  { %p613_p9 = pnand %p612_p8, %p606_p5 }
  0x36   :  { %616 = shalt.err (!%p613_p9)
}
  0x37   :  { %53 = dma.hbm_to_vmem [thread:$0]  %s835_s3, 1024, %s48_s30, [#allocation6], %s670_s11, %s670_s11, %s671_s12  }
  0x38   :  { %s617_s23 = scalar_lea.hbm %s837_s5, 1024 }
  0x39   :  { %p618_p10 = scmp.ne.s32.totalorder %s837_s5, %s617_s23  ;;  %p621_p11 = scmp.lt.u32.totalorder %s617_s23, %s837_s5 }
  0x3b   :  { %p623_p12 = pnand %p621_p11, %p618_p10 }
  0x3d   :  { %626 = shalt.err (!%p623_p12)
}
  0x3e   :  { %s627_s27 = scalar_lea.vmem %s750_s9, 1024  ;;  %p632_p0 = scmp.lt.s32.totalorder %s750_s9, %s750_s9 }
  0x3f   :  { %p628_p13 = scmp.ne.s32.totalorder %s750_s9, %s627_s27  ;;  %p633_p1 = scmp.lt.s32.totalorder %s627_s27, %s627_s27 }
  0x41   :  { %p634_p2 = por %p633_p1, %p632_p0 }
  0x43   :  { %p635_p3 = pnand %p634_p2, %p628_p13 }
  0x45   :  { %638 = shalt.err (!%p635_p3)
}
  0x46   :  { %67 = dma.hbm_to_vmem [thread:$0]  %s837_s5, 1024, %s750_s9, [#allocation9], %s670_s11, %s670_s11, %s671_s12  }
  0x47   :  { %661 = dma.done.wait [#allocation3], 64  }
  0x48   :  { %662 = vsyncadd [#allocation3], 4294967232 }
  0x49   :  { %663 = dma.done.wait [#allocation6], 1216  }
  0x4a   :  { %664 = vsyncadd [#allocation6], 4294966080 }
  0x4b   :  { %665 = dma.done.wait [#allocation9], 1024  }
  0x4c   :  { %666 = vsyncadd [#allocation9], 4294966272  ;;  %v106_v0 = vlaneseq  ;;  %v677_v1 = vmov 0.0   ;;  %vm678_vm0 = vmmov 0   ;;  %v679_v2 = vmov 1966171168  }
  0x4d   :  { %471 = vmatprep.subr.bf16.mxu0 %v677_v1  ;;  %475 = vmatprep.mubr.msk.bf16.mxu0 %vm678_vm0, %v677_v1  ;;  %v104_v3 = vunpack.c.l.s4 %v679_v2  ;;  %v533_v6 = vld [vmem:[#allocation5] sm:$0xff]   ;;  %vm138_vm1 = vcmask 1043456   ;;  %v534_v7 = vld [vmem:[#allocation5 + $0x8] ss:$0 sps:$4 sm:$0xff]   ;;  %v83_v8 = vld [vmem:[#allocation2] sm:$0x1] }
  0x4e   :  { %479 = vmatprep.subr.bf16.mxu1 %v677_v1  ;;  %495 = vmatprep.mubr.msk.bf16.mxu1 %vm678_vm0, %v677_v1  ;;  %v107_v5 = vshrl.u32 %v106_v0, 7  ;;  %v84_v10 = vld [vmem:[#allocation2 + $0x1] sm:$0x1]  ;;  %v85_v11 = vld [vmem:[#allocation2 + $0x2] sm:$0x1]  ;;  %v140_v13 = vsel %vm138_vm1, %v534_v7, 0 }
  0x4f   :  { %v105_v4 = vunpack.c.0.s8 %v104_v3  ;;  %472 = vmatpush3.bf16.msra.mxu0 %v533_v6  ;;  %v86_v12 = vld [vmem:[#allocation2 + $0x3] sm:$0x1]  ;;  %v101_v14 = vcombine.low %v83_v8, %v84_v10  ;;  %v535_v16 = vld [vmem:[#allocation7] sm:$0xff]   ;;  %v536_v19 = vld [vmem:[#allocation7 + $0x8] sm:$0xff]   ;;  %vm134_vm2 = vcmask 195584  }
  0x50   :  { %473 = vmatprep.subr.bf16.mxu0 %v677_v1  ;;  %v102_v15 = vcombine.low %v85_v11, %v86_v12  ;;  %480 = vmatpush3.bf16.msra.mxu1 %v535_v16  ;;  %v537_v22 = vld [vmem:[#allocation7 + $0x10] sm:$0xff]   ;;  %v538_v23 = vld [vmem:[#allocation7 + $0x18] sm:$0xff]   ;;  %v539_v24 = vld [vmem:[#allocation7 + $0x20] sm:$0xff]  }
  0x51   :  { %v108_v9 = vsub.s32 %v105_v4, %v107_v5  ;;  %481 = vmatprep.subr.bf16.mxu1 %v677_v1  ;;  %v540_v25 = vld [vmem:[#allocation7 + $0x28] sm:$0xff]   ;;  %v541_v26 = vld [vmem:[#allocation7 + $0x30] sm:$0xff]   ;;  %v542_v27 = vld [vmem:[#allocation7 + $0x38] sm:$0xff]  }
  0x52   :  { %v543_v28 = vld [vmem:[#allocation8] sm:$0xff]   ;;  %v544_v29 = vld [vmem:[#allocation8 + $0x8] sm:$0xff]   ;;  %v545_v30 = vld [vmem:[#allocation8 + $0x10] sm:$0xff]  }
  0x53   :  { %v109_v17 = vrot.slane %v101_v14, %v108_v9  ;;  %v116_v18 = vrot.slane %v102_v15, %v108_v9  ;;  %474 = vmatpush3.bf16.msra.mxu0 %v140_v13  ;;  %v546_v31 = vld [vmem:[#allocation8 + $0x18] sm:$0xff]   ;;  %v547_v32 = vld [vmem:[#allocation8 + $0x20] sm:$0xff]   ;;  %v548_v33 = vld [vmem:[#allocation8 + $0x28] sm:$0xff]  }
  0x54   :  { %499 = vmatprep.subr.bf16.mxu0 %v677_v1  ;;  %482 = vmatpush3.bf16.msra.mxu1 %v536_v19  ;;  %v428_v34 = vld [vmem:[%s834_s2] ss:$0 sm:$0xff]  ;;  %v550_v43 = vld [vmem:[#allocation8 + $0x38] sm:$0xff]  }
  0x55   :  { %v117_v20 = vcombine.low %v109_v17, %v116_v18  ;;  %483 = vmatprep.subr.bf16.mxu1 %v677_v1  ;;  %v549_v42 = vld [vmem:[#allocation8 + $0x30] sm:$0xff]  }
  0x56   :  { %v432_v44 = vld [vmem:[%s836_s4] ss:$0 sm:$0xff] }
  0x57   :  { %v124_v21 = vrot.slane %v117_v20, %v108_v9  ;;  %v441_v52 = vld [vmem:[%s838_s6] ss:$0 sm:$0xff] }
  0x58   :  { %484 = vmatpush3.bf16.msra.mxu1 %v537_v22 }
  0x59   :  { %476 = vmatmul.mubr.msk.bf16.vlgmr.msra.gmra.mrb[0].mxu0 %vm134_vm2, %v124_v21  ;;  %485 = vmatprep.subr.bf16.mxu1 %v677_v1 }
  0x5a   :  { %515 = vmatprep.mubr.msk.bf16.mxu0 %vm678_vm0, %v677_v1  ;;  %500 = vmatpush3.bf16.msra.mxu0 %v543_v28 }
  0x5b   :  { %501 = vmatprep.subr.bf16.mxu0 %v677_v1 }
  0x5c   :  { %486 = vmatpush3.bf16.msra.mxu1 %v538_v23 }
  0x5d   :  { %487 = vmatprep.subr.bf16.mxu1 %v677_v1 }
  0x5e   :  { %502 = vmatpush3.bf16.msra.mxu0 %v544_v29 }
  0x5f   :  { %503 = vmatprep.subr.bf16.mxu0 %v677_v1 }
  0x60   :  { %488 = vmatpush3.bf16.msra.mxu1 %v539_v24 }
  0x61   :  { %489 = vmatprep.subr.bf16.mxu1 %v677_v1 }
  0x62   :  { %504 = vmatpush3.bf16.msra.mxu0 %v545_v30 }
  0x63   :  { %505 = vmatprep.subr.bf16.mxu0 %v677_v1 }
  0x64   :  { %490 = vmatpush3.bf16.msra.mxu1 %v540_v25 }
  0x65   :  { %491 = vmatprep.subr.bf16.mxu1 %v677_v1 }
  0x66   :  { %506 = vmatpush3.bf16.msra.mxu0 %v546_v31 }
  0x67   :  { %507 = vmatprep.subr.bf16.mxu0 %v677_v1 }
  0x68   :  { %492 = vmatpush3.bf16.msra.mxu1 %v541_v26 }
  0x69   :  { %493 = vmatprep.subr.bf16.mxu1 %v677_v1 }
  0x6a   :  { %508 = vmatpush3.bf16.msra.mxu0 %v547_v32 }
  0x6b   :  { %509 = vmatprep.subr.bf16.mxu0 %v677_v1 }
  0x6c   :  { %494 = vmatpush3.bf16.msra.mxu1 %v542_v27 }
  0x6e   :  { %510 = vmatpush3.bf16.msra.mxu0 %v548_v33 }
  0x6f   :  { %511 = vmatprep.subr.bf16.mxu0 %v677_v1 }
  0x72   :  { %512 = vmatpush3.bf16.msra.mxu0 %v549_v42 }
  0x73   :  { %513 = vmatprep.subr.bf16.mxu0 %v677_v1 }
  0x76   :  { %514 = vmatpush3.bf16.msra.mxu0 %v550_v43 }
 0x12c   :  { %v176_v35 = vpop.f32.mrb[0].mxu0 }
 0x12d   :  { %v177_v36 = vadd.f32 %v428_v34, %v176_v35  ;;  %v477_v37 = vpop.f32.mrb[1].mxu0 }
 0x12e   :  { %v179_v38 = vpop.f32.mrb[2].mxu0 }
 0x12f   :  { %v182_v39 = vmax.f32 %v177_v36, 0.0  ;;  %v478_v40 = vpop.f32.mrb[3].mxu0 }
 0x131   :  { %v183_v41 = vpack.c.bf16 %v182_v39, %v182_v39 }
 0x133   :  { %496 = vmatmul.mubr.bf16.vlgmr.msra.gmra.mrb[0].mxu1 %v183_v41 }
 0x206   :  { %v289_v45 = vpop.f32.mrb[0].mxu1 }
 0x207   :  { %v290_v46 = vadd.f32 %v432_v44, %v289_v45  ;;  %v497_v47 = vpop.f32.mrb[1].mxu1 }
 0x208   :  { %v292_v48 = vpop.f32.mrb[2].mxu1 }
 0x209   :  { %v295_v49 = vmax.f32 %v290_v46, 0.0  ;;  %v498_v50 = vpop.f32.mrb[3].mxu1 }
 0x20b   :  { %v296_v51 = vpack.c.bf16 %v295_v49, %v295_v49 }
 0x20d   :  { %516 = vmatmul.mubr.bf16.vlgmr.msra.gmra.mrb[4].mxu0 %v296_v51 }
 0x2e0   :  { %v402_v53 = vpop.f32.mrb[4].mxu0 }
 0x2e1   :  { %v403_v54 = vadd.f32 %v441_v52, %v402_v53  ;;  %v517_v55 = vpop.f32.mrb[5].mxu0 }
 0x2e2   :  { %v405_v56 = vpop.f32.mrb[6].mxu0 }
 0x2e3   :  { %408 = vst [vmem:[#allocation10] sm:$0xff] %v403_v54  ;;  %v518_v57 = vpop.f32.mrb[7].mxu0 }
 0x2e4   :  { %413 = vsyncadd [#allocation4], 96  ;;  %s680_s4 = smov [#allocation10]  }
 0x2e5   :  { %s414_s8 = sshll.u32 %s680_s4, 4  ;;  %s415_s8 = int_to_ptr.vmem [resolvable:$true] %s414_s8 }
 0x2e6   :  { %s639_s9 = scalar_lea.vmem %s415_s8, 32  ;;  %s643_s10 = scalar_lea.vmem %s415_s8, 128 }
 0x2e7   :  { %p640_p4 = scmp.ne.s32.totalorder %s415_s8, %s639_s9  ;;  %p644_p5 = scmp.lt.s32.totalorder %s415_s8, %s415_s8 }
 0x2e8   :  { %p645_p6 = scmp.lt.s32.totalorder %s643_s10, %s639_s9 }
 0x2ea   :  { %p646_p7 = por %p645_p6, %p644_p5 }
 0x2ec   :  { %p647_p8 = pnand %p646_p7, %p640_p4 }
 0x2ee   :  { %650 = shalt.err (!%p647_p8)
}
 0x2ef   :  { %s651_s14 = scalar_lea.hbm %s839_s7, 32 }
 0x2f0   :  { %p652_p9 = scmp.ne.s32.totalorder %s839_s7, %s651_s14  ;;  %p655_p10 = scmp.lt.u32.totalorder %s651_s14, %s839_s7 }
 0x2f2   :  { %p657_p11 = pnand %p655_p10, %p652_p9 }
 0x2f4   :  { %660 = shalt.err (!%p657_p11)
}
 0x2f5   :  { %s681_s0 = smov 32   ;;  %s682_s16 = smov 2  }
 0x2f6   :  { %420 = dma.vmem_to_hbm [thread:$0]  %s415_s8, 32, %s839_s7, [#allocation4], %s681_s0, %s681_s0, %s682_s16  }
 0x2f7   :  { %667 = dma.done.wait [#allocation4], 128  }
 0x2f8   :  { %668 = vsyncadd [#allocation4], 4294967168 }
 0x2f9   :  { %424 = vsyncpa [#allocation3], 1 }
 0x2fa   :  { %425 = vsyncpa [#allocation6], 1 }
 0x2fb   :  { %426 = vsyncpa [#allocation9], 1 }
 0x2fc   :  { %427 = vsyncpa [#allocation4], 1 }

// kernel: tpu_custom_call.1
= control target key start
LH: loop header
LB: loop body
LE: loop exit
PB: predicated region body
PF: predicated region fallthrough
CT: control target
= control target key end

     0   :  { %12 = vsyncpa [#allocation3], 0  ;;  %s832_s0 = inlined_call_operand.hbm [shape: bf16[2,24], index: 0, kind: input, shape index: {}]   ;;  %s833_s1 = inlined_call_operand.hbm [shape: bf16[24,128], index: 1, kind: input, shape index: {}]   ;;  %s834_s2 = inlined_call_operand.vmem [shape: f32[1,128], index: 2, kind: input, shape index: {}]   ;;  %s835_s3 = inlined_call_operand.hbm [shape: bf16[128,128], index: 3, kind: input, shape index: {}]   ;;  %s836_s4 = inlined_call_operand.vmem [shape: f32[1,128], index: 4, kind: input, shape index: {}]   ;;  %s837_s5 = inlined_call_operand.hbm [shape: bf16[128,128], index: 5, kind: input, shape index: {}]   ;;  %s838_s6 = inlined_call_operand.vmem [shape: f32[1,128], index: 6, kind: input, shape index: {}]   ;;  %s839_s7 = inlined_call_operand.hbm [shape: f32[2,128], index: 7, kind: output, shape index: {}]  }
   0x1   :  { %13 = vsyncpa [#allocation6], 0 }
   0x2   :  { %14 = vsyncpa [#allocation9], 0 }
   0x3   :  { %15 = vsyncpa [#allocation4], 0 }
   0x4   :  { %20 = vsyncadd [#allocation3], 48  ;;  %s669_s24 = smov [#allocation5]   ;;  %s551_s28 = scalar_lea.hbm %s833_s1, 192 }
   0x5   :  { %s33_s25 = sshll.u32 %s669_s24, 4  ;;  %p552_p0 = scmp.ne.s32.totalorder %s833_s1, %s551_s28  ;;  %s34_s25 = int_to_ptr.vmem [resolvable:$true] %s33_s25 }
   0x6   :  { %p555_p1 = scmp.lt.u32.totalorder %s551_s28, %s833_s1 }
   0x8   :  { %p557_p2 = pnand %p555_p1, %p552_p0 }
   0xa   :  { %560 = shalt.err (!%p557_p2)
}
   0xb   :  { %s561_s10 = scalar_lea.vmem %s34_s25, 192  ;;  %p566_p4 = scmp.lt.s32.totalorder %s34_s25, %s34_s25 }
   0xc   :  { %p562_p3 = scmp.ne.s32.totalorder %s34_s25, %s561_s10  ;;  %p567_p5 = scmp.lt.s32.totalorder %s561_s10, %s561_s10 }
   0xe   :  { %p568_p6 = por %p567_p5, %p566_p4 }
  0x10   :  { %p569_p7 = pnand %p568_p6, %p562_p3 }
  0x12   :  { %572 = shalt.err (!%p569_p7)
}
  0x13   :  { %s670_s11 = smov 64   ;;  %s671_s12 = smov 4  }
  0x14   :  { %39 = dma.hbm_to_vmem [thread:$0]  %s833_s1, 192, %s34_s25, [#allocation6], %s670_s11, %s670_s11, %s671_s12  }
  0x15   :  { %s672_s15 = smov [#allocation2]   ;;  %s573_s19 = scalar_lea.hbm %s832_s0, 16 }
  0x16   :  { %s21_s16 = sshll.u32 %s672_s15, 4  ;;  %p574_p8 = scmp.ne.s32.totalorder %s832_s0, %s573_s19  ;;  %s22_s16 = int_to_ptr.vmem [resolvable:$true] %s21_s16 }
  0x17   :  { %p577_p9 = scmp.lt.u32.totalorder %s573_s19, %s832_s0 }
  0x19   :  { %p579_p10 = pnand %p577_p9, %p574_p8 }
  0x1b   :  { %582 = shalt.err (!%p579_p10)
}
  0x1c   :  { %s583_s24 = scalar_lea.vmem %s22_s16, 16  ;;  %s587_s1 = scalar_lea.vmem %s22_s16, 64 }
  0x1d   :  { %p584_p11 = scmp.ne.s32.totalorder %s22_s16, %s583_s24  ;;  %p588_p12 = scmp.lt.s32.totalorder %s22_s16, %s22_s16 }
  0x1e   :  { %p589_p13 = scmp.lt.s32.totalorder %s587_s1, %s583_s24 }
  0x20   :  { %p590_p0 = por %p589_p13, %p588_p12 }
  0x22   :  { %p591_p1 = pnand %p590_p0, %p584_p11 }
  0x24   :  { %594 = shalt.err (!%p591_p1)
}
  0x25   :  { %s673_s25 = smov 16   ;;  %s674_s26 = smov 1  }
  0x26   :  { %27 = dma.hbm_to_vmem [thread:$0]  %s832_s0, 16, %s22_s16, [#allocation3], %s673_s25, %s673_s25, %s674_s26  }
  0x27   :  { %s675_s29 = smov [#allocation7]   ;;  %s676_s8 = smov [#allocation8]  }
  0x28   :  { %s47_s30 = sshll.u32 %s675_s29, 4  ;;  %s61_s9 = sshll.u32 %s676_s8, 4  ;;  %s48_s30 = int_to_ptr.vmem [resolvable:$true] %s47_s30  ;;  %s750_s9 = int_to_ptr.vmem [resolvable:$true] %s61_s9 }
  0x29   :  { %s595_s14 = scalar_lea.hbm %s835_s3, 1024 }
  0x2a   :  { %p596_p2 = scmp.ne.s32.totalorder %s835_s3, %s595_s14  ;;  %p599_p3 = scmp.lt.u32.totalorder %s595_s14, %s835_s3 }
  0x2c   :  { %p601_p4 = pnand %p599_p3, %p596_p2 }
  0x2e   :  { %604 = shalt.err (!%p601_p4)
}
  0x2f   :  { %s605_s0 = scalar_lea.vmem %s48_s30, 1024  ;;  %p610_p6 = scmp.lt.s32.totalorder %s48_s30, %s48_s30 }
  0x30   :  { %p606_p5 = scmp.ne.s32.totalorder %s48_s30, %s605_s0  ;;  %p611_p7 = scmp.lt.s32.totalorder %s605_s0, %s605_s0 }
  0x32   :  { %p612_p8 = por %p611_p7, %p610_p6 }
  0x34   :  { %p613_p9 = pnand %p612_p8, %p606_p5 }
  0x36   :  { %616 = shalt.err (!%p613_p9)
}
  0x37   :  { %53 = dma.hbm_to_vmem [thread:$0]  %s835_s3, 1024, %s48_s30, [#allocation6], %s670_s11, %s670_s11, %s671_s12  }
  0x38   :  { %s617_s23 = scalar_lea.hbm %s837_s5, 1024 }
  0x39   :  { %p618_p10 = scmp.ne.s32.totalorder %s837_s5, %s617_s23  ;;  %p621_p11 = scmp.lt.u32.totalorder %s617_s23, %s837_s5 }
  0x3b   :  { %p623_p12 = pnand %p621_p11, %p618_p10 }
  0x3d   :  { %626 = shalt.err (!%p623_p12)
}
  0x3e   :  { %s627_s27 = scalar_lea.vmem %s750_s9, 1024  ;;  %p632_p0 = scmp.lt.s32.totalorder %s750_s9, %s750_s9 }
  0x3f   :  { %p628_p13 = scmp.ne.s32.totalorder %s750_s9, %s627_s27  ;;  %p633_p1 = scmp.lt.s32.totalorder %s627_s27, %s627_s27 }
  0x41   :  { %p634_p2 = por %p633_p1, %p632_p0 }
  0x43   :  { %p635_p3 = pnand %p634_p2, %p628_p13 }
  0x45   :  { %638 = shalt.err (!%p635_p3)
}
  0x46   :  { %67 = dma.hbm_to_vmem [thread:$0]  %s837_s5, 1024, %s750_s9, [#allocation9], %s670_s11, %s670_s11, %s671_s12  }
  0x47   :  { %661 = dma.done.wait [#allocation3], 64  }
  0x48   :  { %662 = vsyncadd [#allocation3], 4294967232 }
  0x49   :  { %663 = dma.done.wait [#allocation6], 1216  }
  0x4a   :  { %664 = vsyncadd [#allocation6], 4294966080 }
  0x4b   :  { %665 = dma.done.wait [#allocation9], 1024  }
  0x4c   :  { %666 = vsyncadd [#allocation9], 4294966272  ;;  %v106_v0 = vlaneseq  ;;  %v677_v1 = vmov 0.0   ;;  %vm678_vm0 = vmmov 0   ;;  %v679_v2 = vmov 1966171168  }
  0x4d   :  { %471 = vmatprep.subr.bf16.mxu0 %v677_v1  ;;  %475 = vmatprep.mubr.msk.bf16.mxu0 %vm678_vm0, %v677_v1  ;;  %v104_v3 = vunpack.c.l.s4 %v679_v2  ;;  %v533_v6 = vld [vmem:[#allocation5] sm:$0xff]   ;;  %vm138_vm1 = vcmask 1043456   ;;  %v534_v7 = vld [vmem:[#allocation5 + $0x8] ss:$0 sps:$4 sm:$0xff]   ;;  %v83_v8 = vld [vmem:[#allocation2] sm:$0x1] }
  0x4e   :  { %479 = vmatprep.subr.bf16.mxu1 %v677_v1  ;;  %495 = vmatprep.mubr.msk.bf16.mxu1 %vm678_vm0, %v677_v1  ;;  %v107_v5 = vshrl.u32 %v106_v0, 7  ;;  %v84_v10 = vld [vmem:[#allocation2 + $0x1] sm:$0x1]  ;;  %v85_v11 = vld [vmem:[#allocation2 + $0x2] sm:$0x1]  ;;  %v140_v13 = vsel %vm138_vm1, %v534_v7, 0 }
  0x4f   :  { %v105_v4 = vunpack.c.0.s8 %v104_v3  ;;  %472 = vmatpush3.bf16.msra.mxu0 %v533_v6  ;;  %v86_v12 = vld [vmem:[#allocation2 + $0x3] sm:$0x1]  ;;  %v101_v14 = vcombine.low %v83_v8, %v84_v10  ;;  %v535_v16 = vld [vmem:[#allocation7] sm:$0xff]   ;;  %v536_v19 = vld [vmem:[#allocation7 + $0x8] sm:$0xff]   ;;  %vm134_vm2 = vcmask 195584  }
  0x50   :  { %473 = vmatprep.subr.bf16.mxu0 %v677_v1  ;;  %v102_v15 = vcombine.low %v85_v11, %v86_v12  ;;  %480 = vmatpush3.bf16.msra.mxu1 %v535_v16  ;;  %v537_v22 = vld [vmem:[#allocation7 + $0x10] sm:$0xff]   ;;  %v538_v23 = vld [vmem:[#allocation7 + $0x18] sm:$0xff]   ;;  %v539_v24 = vld [vmem:[#allocation7 + $0x20] sm:$0xff]  }
  0x51   :  { %v108_v9 = vsub.s32 %v105_v4, %v107_v5  ;;  %481 = vmatprep.subr.bf16.mxu1 %v677_v1  ;;  %v540_v25 = vld [vmem:[#allocation7 + $0x28] sm:$0xff]   ;;  %v541_v26 = vld [vmem:[#allocation7 + $0x30] sm:$0xff]   ;;  %v542_v27 = vld [vmem:[#allocation7 + $0x38] sm:$0xff]  }
  0x52   :  { %v543_v28 = vld [vmem:[#allocation8] sm:$0xff]   ;;  %v544_v29 = vld [vmem:[#allocation8 + $0x8] sm:$0xff]   ;;  %v545_v30 = vld [vmem:[#allocation8 + $0x10] sm:$0xff]  }
  0x53   :  { %v109_v17 = vrot.slane %v101_v14, %v108_v9  ;;  %v116_v18 = vrot.slane %v102_v15, %v108_v9  ;;  %474 = vmatpush3.bf16.msra.mxu0 %v140_v13  ;;  %v546_v31 = vld [vmem:[#allocation8 + $0x18] sm:$0xff]   ;;  %v547_v32 = vld [vmem:[#allocation8 + $0x20] sm:$0xff]   ;;  %v548_v33 = vld [vmem:[#allocation8 + $0x28] sm:$0xff]  }
  0x54   :  { %499 = vmatprep.subr.bf16.mxu0 %v677_v1  ;;  %482 = vmatpush3.bf16.msra.mxu1 %v536_v19  ;;  %v428_v34 = vld [vmem:[%s834_s2] ss:$0 sm:$0xff]  ;;  %v550_v43 = vld [vmem:[#allocation8 + $0x38] sm:$0xff]  }
  0x55   :  { %v117_v20 = vcombine.low %v109_v17, %v116_v18  ;;  %483 = vmatprep.subr.bf16.mxu1 %v677_v1  ;;  %v549_v42 = vld [vmem:[#allocation8 + $0x30] sm:$0xff]  }
  0x56   :  { %v432_v44 = vld [vmem:[%s836_s4] ss:$0 sm:$0xff] }
  0x57   :  { %v124_v21 = vrot.slane %v117_v20, %v108_v9  ;;  %v441_v52 = vld [vmem:[%s838_s6] ss:$0 sm:$0xff] }
  0x58   :  { %484 = vmatpush3.bf16.msra.mxu1 %v537_v22 }
  0x59   :  { %476 = vmatmul.mubr.msk.bf16.vlgmr.msra.gmra.mrb[0].mxu0 %vm134_vm2, %v124_v21  ;;  %485 = vmatprep.subr.bf16.mxu1 %v677_v1 }
  0x5a   :  { %515 = vmatprep.mubr.msk.bf16.mxu0 %vm678_vm0, %v677_v1  ;;  %500 = vmatpush3.bf16.msra.mxu0 %v543_v28 }
  0x5b   :  { %501 = vmatprep.subr.bf16.mxu0 %v677_v1 }
  0x5c   :  { %486 = vmatpush3.bf16.msra.mxu1 %v538_v23 }
  0x5d   :  { %487 = vmatprep.subr.bf16.mxu1 %v677_v1 }
  0x5e   :  { %502 = vmatpush3.bf16.msra.mxu0 %v544_v29 }
  0x5f   :  { %503 = vmatprep.subr.bf16.mxu0 %v677_v1 }
  0x60   :  { %488 = vmatpush3.bf16.msra.mxu1 %v539_v24 }
  0x61   :  { %489 = vmatprep.subr.bf16.mxu1 %v677_v1 }
  0x62   :  { %504 = vmatpush3.bf16.msra.mxu0 %v545_v30 }
  0x63   :  { %505 = vmatprep.subr.bf16.mxu0 %v677_v1 }
  0x64   :  { %490 = vmatpush3.bf16.msra.mxu1 %v540_v25 }
  0x65   :  { %491 = vmatprep.subr.bf16.mxu1 %v677_v1 }
  0x66   :  { %506 = vmatpush3.bf16.msra.mxu0 %v546_v31 }
  0x67   :  { %507 = vmatprep.subr.bf16.mxu0 %v677_v1 }
  0x68   :  { %492 = vmatpush3.bf16.msra.mxu1 %v541_v26 }
  0x69   :  { %493 = vmatprep.subr.bf16.mxu1 %v677_v1 }
  0x6a   :  { %508 = vmatpush3.bf16.msra.mxu0 %v547_v32 }
  0x6b   :  { %509 = vmatprep.subr.bf16.mxu0 %v677_v1 }
  0x6c   :  { %494 = vmatpush3.bf16.msra.mxu1 %v542_v27 }
  0x6e   :  { %510 = vmatpush3.bf16.msra.mxu0 %v548_v33 }
  0x6f   :  { %511 = vmatprep.subr.bf16.mxu0 %v677_v1 }
  0x72   :  { %512 = vmatpush3.bf16.msra.mxu0 %v549_v42 }
  0x73   :  { %513 = vmatprep.subr.bf16.mxu0 %v677_v1 }
  0x76   :  { %514 = vmatpush3.bf16.msra.mxu0 %v550_v43 }
 0x12c   :  { %v176_v35 = vpop.f32.mrb[0].mxu0 }
 0x12d   :  { %v177_v36 = vadd.f32 %v428_v34, %v176_v35  ;;  %v477_v37 = vpop.f32.mrb[1].mxu0 }
 0x12e   :  { %v179_v38 = vpop.f32.mrb[2].mxu0 }
 0x12f   :  { %v182_v39 = vmax.f32 %v177_v36, 0.0  ;;  %v478_v40 = vpop.f32.mrb[3].mxu0 }
 0x131   :  { %v183_v41 = vpack.c.bf16 %v182_v39, %v182_v39 }
 0x133   :  { %496 = vmatmul.mubr.bf16.vlgmr.msra.gmra.mrb[0].mxu1 %v183_v41 }
 0x206   :  { %v289_v45 = vpop.f32.mrb[0].mxu1 }
 0x207   :  { %v290_v46 = vadd.f32 %v432_v44, %v289_v45  ;;  %v497_v47 = vpop.f32.mrb[1].mxu1 }
 0x208   :  { %v292_v48 = vpop.f32.mrb[2].mxu1 }
 0x209   :  { %v295_v49 = vmax.f32 %v290_v46, 0.0  ;;  %v498_v50 = vpop.f32.mrb[3].mxu1 }
 0x20b   :  { %v296_v51 = vpack.c.bf16 %v295_v49, %v295_v49 }
 0x20d   :  { %516 = vmatmul.mubr.bf16.vlgmr.msra.gmra.mrb[4].mxu0 %v296_v51 }
 0x2e0   :  { %v402_v53 = vpop.f32.mrb[4].mxu0 }
 0x2e1   :  { %v403_v54 = vadd.f32 %v441_v52, %v402_v53  ;;  %v517_v55 = vpop.f32.mrb[5].mxu0 }
 0x2e2   :  { %v405_v56 = vpop.f32.mrb[6].mxu0 }
 0x2e3   :  { %408 = vst [vmem:[#allocation10] sm:$0xff] %v403_v54  ;;  %v518_v57 = vpop.f32.mrb[7].mxu0 }
 0x2e4   :  { %413 = vsyncadd [#allocation4], 96  ;;  %s680_s4 = smov [#allocation10]  }
 0x2e5   :  { %s414_s8 = sshll.u32 %s680_s4, 4  ;;  %s415_s8 = int_to_ptr.vmem [resolvable:$true] %s414_s8 }
 0x2e6   :  { %s639_s9 = scalar_lea.vmem %s415_s8, 32  ;;  %s643_s10 = scalar_lea.vmem %s415_s8, 128 }
 0x2e7   :  { %p640_p4 = scmp.ne.s32.totalorder %s415_s8, %s639_s9  ;;  %p644_p5 = scmp.lt.s32.totalorder %s415_s8, %s415_s8 }
 0x2e8   :  { %p645_p6 = scmp.lt.s32.totalorder %s643_s10, %s639_s9 }
 0x2ea   :  { %p646_p7 = por %p645_p6, %p644_p5 }
 0x2ec   :  { %p647_p8 = pnand %p646_p7, %p640_p4 }
 0x2ee   :  { %650 = shalt.err (!%p647_p8)
}
 0x2ef   :  { %s651_s14 = scalar_lea.hbm %s839_s7, 32 }
 0x2f0   :  { %p652_p9 = scmp.ne.s32.totalorder %s839_s7, %s651_s14  ;;  %p655_p10 = scmp.lt.u32.totalorder %s651_s14, %s839_s7 }
 0x2f2   :  { %p657_p11 = pnand %p655_p10, %p652_p9 }
 0x2f4   :  { %660 = shalt.err (!%p657_p11)
}
 0x2f5   :  { %s681_s0 = smov 32   ;;  %s682_s16 = smov 2  }
 0x2f6   :  { %420 = dma.vmem_to_hbm [thread:$0]  %s415_s8, 32, %s839_s7, [#allocation4], %s681_s0, %s681_s0, %s682_s16  }
 0x2f7   :  { %667 = dma.done.wait [#allocation4], 128  }
 0x2f8   :  { %668 = vsyncadd [#allocation4], 4294967168 }
 0x2f9   :  { %424 = vsyncpa [#allocation3], 1 }
 0x2fa   :  { %425 = vsyncpa [#allocation6], 1 }
 0x2fb   :  { %426 = vsyncpa [#allocation9], 1 }
 0x2fc   :  { %427 = vsyncpa [#allocation4], 1 }

</bundles_post_ra>
